<compile_context>
chip_gen: v5e
topology: v5e:2x2
jax: 0.10.0
libtpu: 0.0.40
codegen_flags: <defaults>
</compile_context>

<pallas_src>
import functools
import math

import jax
import jax.numpy as jnp
import numpy as np
from jax.experimental import pallas as pl
from jax.experimental.pallas import tpu as pltpu


@functools.lru_cache(maxsize=None)
def _interp_matrix_np(out_size: int, in_size: int, align_corners: bool) -> np.ndarray:
    """(out_size, in_size) linear-interp matrix matching torch bilinear."""
    i = np.arange(out_size, dtype=np.float64)
    if align_corners:
        if out_size > 1:
            src = i * (in_size - 1) / (out_size - 1)
        else:
            src = np.zeros_like(i)
    else:
        src = (i + 0.5) * (in_size / out_size) - 0.5
        src = np.maximum(src, 0.0)  # PyTorch clamps negative source coords to 0
    i0 = np.minimum(np.floor(src).astype(np.int64), in_size - 1)
    i1 = np.minimum(i0 + 1, in_size - 1)
    w1 = src - i0
    w0 = 1.0 - w1
    a = np.zeros((out_size, in_size), np.float64)
    rows = np.arange(out_size)
    np.add.at(a, (rows, i0), w0)   # duplicate-index add handles the boundary clamp
    np.add.at(a, (rows, i1), w1)
    return a.astype(np.float32)


@functools.lru_cache(maxsize=None)
def _w_interp_kron_np(wo: int, w: int, c: int, align_corners: bool) -> np.ndarray:
    """kron(A_w^T, I_C): (W*C, Wo*C) matrix applying the W-interp on the flattened
    (W*C) lane axis of an NHWC image row."""
    aw = _interp_matrix_np(wo, w, align_corners)           # (Wo, W)
    return np.kron(aw.T, np.eye(c, dtype=np.float32))      # (W*C, Wo*C)


def _pick_row_tile(ho: int, max_tile: int = 256) -> int:
    """Largest multiple-of-8 divisor of Ho that is <= max_tile (or Ho itself)."""
    if ho <= max_tile:
        return ho
    best = 0
    t = 8
    while t <= max_tile:
        if ho % t == 0:
            best = t
        t += 8
    return best if best else ho


def _upsample_kernel(x_ref, ah_ref, kw_ref, o_ref):
    # x_ref : (H, W*C)     one NHWC image with (W, C) flattened into lanes
    # ah_ref: (th, H)      rows of the H-interp matrix for this output-row tile
    # kw_ref: (W*C, Wo*C)  kron(A_w^T, I_C): W-interp on the flattened lane axis
    # o_ref : (th, Wo*C)
    y = jnp.dot(ah_ref[...], x_ref[...], preferred_element_type=jnp.float32)
    y = y.astype(kw_ref.dtype)   # keep bf16 operands bf16 (2x MXU rate); no-op for f32
    o = jnp.dot(y, kw_ref[...], preferred_element_type=jnp.float32)
    o_ref[...] = o.astype(o_ref.dtype)


def upsample_att(x, scale_factor: int = 2, mode: str = "bilinear",
                 align_corners: bool = False):
    """Forward pass of UpsampleAtt.  x: (N, H, W, C) NHWC -> (N, Ho, Wo, C)."""
    if mode != "bilinear":
        # TODO(synk): only 'bilinear' mode implemented (module default).
        raise NotImplementedError("only bilinear mode is implemented")

    N, H, W, C = x.shape
    Ho = int(math.floor(H * scale_factor))
    Wo = int(math.floor(W * scale_factor))

    # Keep bf16 as bf16; anything else (f16 / int) is computed & returned in f32.
    if x.dtype not in (jnp.bfloat16, jnp.float32):
        x = x.astype(jnp.float32)
    op_dtype = x.dtype

    ah = jnp.asarray(_interp_matrix_np(Ho, H, align_corners), dtype=op_dtype)      # (Ho, H)
    kw = jnp.asarray(_w_interp_kron_np(Wo, W, C, align_corners), dtype=op_dtype)   # (W*C, Wo*C)

    WC, WoC = W * C, Wo * C
    x2 = x.reshape(N, H, WC)            # free: contiguous NHWC -> (N, H, W*C)

    th = _pick_row_tile(Ho)
    gh = Ho // th
    itemsize = np.dtype(op_dtype).itemsize

    # Advisory cost model for XLA scheduling.
    flops = 2 * N * (Ho * H * WC + Ho * WC * WoC)
    bytes_accessed = itemsize * (N * H * WC + N * Ho * WoC + Ho * H + WC * WoC)
    cost = pl.CostEstimate(flops=int(flops), transcendentals=0,
                           bytes_accessed=int(bytes_accessed))

    # Raise the scoped VMEM limit only if the (double-buffered) blocks need it.
    vmem_need = 2 * itemsize * (H * WC + th * H + WC * WoC + th * WoC) + (1 << 20)
    cp_kwargs = {}
    if vmem_need > 32 * 1024 * 1024:
        cp_kwargs["vmem_limit_bytes"] = int(min(vmem_need, 128 * 1024 * 1024))

    out2 = pl.pallas_call(
        _upsample_kernel,
        out_shape=jax.ShapeDtypeStruct((N, Ho, WoC), x.dtype),
        grid=(N, gh),
        in_specs=[
            # x / kw block indices are constant across the Ho-tile axis -> DMA'd once.
            pl.BlockSpec((None, H, WC), lambda n, i: (n, 0, 0)),
            pl.BlockSpec((th, H),       lambda n, i: (i, 0)),
            pl.BlockSpec((WC, WoC),     lambda n, i: (0, 0)),
        ],
        out_specs=pl.BlockSpec((None, th, WoC), lambda n, i: (n, i, 0)),
        compiler_params=pltpu.CompilerParams(
            dimension_semantics=("parallel", "parallel"), **cp_kwargs),
        cost_estimate=cost,
    )(x2, ah, kw)

    return out2.reshape(N, Ho, Wo, C)   # free: contiguous (N, Ho, Wo*C) -> NHWC


if __name__ == "__main__":
    key = jax.random.PRNGKey(0)
    N, H, W, C = 2, 16, 16, 4
    x = jax.random.normal(key, (N, H, W, C), dtype=jnp.float32)

    out = upsample_att(x, scale_factor=2, mode="bilinear", align_corners=False)
    out = jax.block_until_ready(out)
    assert out.shape == (N, 2 * H, 2 * W, C)

    # Plain-JAX reference using the same (PyTorch-exact) interpolation matrices.
    ah_ref = jnp.asarray(_interp_matrix_np(2 * H, H, False))
    aw_ref = jnp.asarray(_interp_matrix_np(2 * W, W, False))
    ref = jnp.einsum("oh,nhwc->nowc", ah_ref, x)
    ref = jnp.einsum("pw,nowc->nopc", aw_ref, ref)
    np.testing.assert_allclose(np.asarray(out), np.asarray(ref), rtol=1e-5, atol=1e-5)

    print("KERNEL_OK")
</pallas_src>

<mosaic_0001>
module attributes {stable_mosaic.version = 11 : i64} {
  func.func @_upsample_kernel(%arg0: i32, %arg1: i32, %arg2: memref<1x16x64xf32, #tpu.memory_space<vmem>>, %arg3: memref<32x16xf32, #tpu.memory_space<vmem>>, %arg4: memref<64x128xf32, #tpu.memory_space<vmem>>, %arg5: memref<1x32x128xf32, #tpu.memory_space<vmem>>) attributes {dimension_semantics = [#tpu.dimension_semantics<parallel>, #tpu.dimension_semantics<parallel>], iteration_bounds = array<i64: 2, 1>, scalar_prefetch = 0 : i64, scratch_operands = 0 : i64, tpu.core_type = #tpu.core_type<tc>, window_params = [{transform_indices = @transform_0, window_bounds = array<i64: 1, 16, 64>}, {transform_indices = @transform_1, window_bounds = array<i64: 32, 16>}, {pipeline_mode = #tpu.pipeline_mode<synchronous>, transform_indices = @transform_2, window_bounds = array<i64: 64, 128>}, {transform_indices = @transform_3, window_bounds = array<i64: 1, 32, 128>}]} {
    %c0 = arith.constant 0 : index
    %c0_0 = arith.constant 0 : index
    %0 = vector.load %arg3[%c0, %c0_0] : memref<32x16xf32, #tpu.memory_space<vmem>>, vector<32x16xf32>
    %c0_1 = arith.constant 0 : index
    %c0_2 = arith.constant 0 : index
    %c0_3 = arith.constant 0 : index
    %1 = vector.load %arg2[%c0_1, %c0_2, %c0_3] : memref<1x16x64xf32, #tpu.memory_space<vmem>>, vector<1x16x64xf32>
    %2 = vector.shape_cast %1 : vector<1x16x64xf32> to vector<16x64xf32>
    %cst = arith.constant dense<0.000000e+00> : vector<32x64xf32>
    %3 = tpu.matmul %0, %2, %cst {dimension_numbers = #tpu.dot_dimension_numbers<[1], [0], [0], [1], [0, 0, 1, 1], [], []>} : vector<32x16xf32>, vector<16x64xf32>, vector<32x64xf32> -> vector<32x64xf32>
    %c0_4 = arith.constant 0 : index
    %c0_5 = arith.constant 0 : index
    %4 = vector.load %arg4[%c0_4, %c0_5] : memref<64x128xf32, #tpu.memory_space<vmem>>, vector<64x128xf32>
    %cst_6 = arith.constant dense<0.000000e+00> : vector<32x128xf32>
    %5 = tpu.matmul %3, %4, %cst_6 {dimension_numbers = #tpu.dot_dimension_numbers<[1], [0], [0], [1], [0, 0, 1, 1], [], []>} : vector<32x64xf32>, vector<64x128xf32>, vector<32x128xf32> -> vector<32x128xf32>
    %c0_7 = arith.constant 0 : index
    %c0_8 = arith.constant 0 : index
    %c0_9 = arith.constant 0 : index
    %6 = vector.load %arg5[%c0_7, %c0_8, %c0_9] : memref<1x32x128xf32, #tpu.memory_space<vmem>>, vector<1x32x128xf32>
    %7 = vector.shape_cast %6 : vector<1x32x128xf32> to vector<32x128xf32>
    %8 = vector.shape_cast %5 : vector<32x128xf32> to vector<1x32x128xf32>
    tpu.vector_store %arg5[%c0_7, %c0_8, %c0_9], %8 {strides = array<i32>} : memref<1x32x128xf32, #tpu.memory_space<vmem>>, vector<1x32x128xf32>,
    return
  }
  func.func @transform_0(%arg0: i32, %arg1: i32) -> (i32, i32, i32) {
    %c0_i32 = arith.constant 0 : i32
    %c0_i32_0 = arith.constant 0 : i32
    %c0_i32_1 = arith.constant 0 : i32
    return %arg0, %c0_i32, %c0_i32_0 : i32, i32, i32
  }
  func.func @transform_1(%arg0: i32, %arg1: i32) -> (i32, i32) {
    %c0_i32 = arith.constant 0 : i32
    %c0_i32_0 = arith.constant 0 : i32
    return %arg1, %c0_i32 : i32, i32
  }
  func.func @transform_2(%arg0: i32, %arg1: i32) -> (i32, i32) {
    %c0_i32 = arith.constant 0 : i32
    %c0_i32_0 = arith.constant 0 : i32
    %c0_i32_1 = arith.constant 0 : i32
    return %c0_i32, %c0_i32_0 : i32, i32
  }
  func.func @transform_3(%arg0: i32, %arg1: i32) -> (i32, i32, i32) {
    %c0_i32 = arith.constant 0 : i32
    %c0_i32_0 = arith.constant 0 : i32
    return %arg0, %arg1, %c0_i32 : i32, i32, i32
  }
}

</mosaic_0001>

<bundles_post_ra>
// kernel: tpu_custom_call.1
= control target key start
LH: loop header
LB: loop body
LE: loop exit
PB: predicated region body
PF: predicated region fallthrough
CT: control target
= control target key end

     0   :  { %8 = vsyncpa [#allocation3], 0  ;;  %s812_s0 = inlined_call_operand.vmem [shape: f32[2,16,64], index: 0, kind: input, shape index: {}]   ;;  %s813_s1 = inlined_call_operand.vmem [shape: f32[32,16], index: 1, kind: input, shape index: {}]   ;;  %s814_s2 = inlined_call_operand.hbm [shape: f32[64,128], index: 2, kind: input, shape index: {}]   ;;  %s815_s3 = inlined_call_operand.hbm [shape: f32[2,32,128], index: 3, kind: output, shape index: {}]  }
   0x1   :  { %9 = vsyncpa [#allocation4], 0 }
   0x2   :  { %11 = vsyncpa [#allocation4 + $0x1], 0  ;;  %s696_s12 = smov 0   ;;  %s698_s13 = smov 0  }
   0x3   :  { %s700_s14 = smov 0   ;;  %s702_s15 = smov 0  }
   0x4   :  { %s704_s16 = smov 0   ;;  %s706_s17 = smov 0  }
   0x5 LB: > { %s443_s18 = sadd.s32 4294967295, %s669_s17   ;;  %s444_s19 = sadd.s32 4294967294, %s669_s17   ;;  %s669_s17 = sphi %s706_s17, %s17_s17   ;;  %s665_s16 = sphi %s704_s16, %s822_s16   ;;  %s661_s15 = sphi %s702_s15, %s821_s15   ;;  %s657_s14 = sphi %s700_s14, %s820_s14   ;;  %s653_s13 = sphi %s698_s13, %s819_s13   ;;  %s649_s12 = sphi %s696_s12, %s818_s12  }
   0x6   : > { %s29_s20 = sadd.s32 1, %s665_s16  ;;  %s111_s21 = sadd.s32 1, %s657_s14 }
   0x7   : > { %p31_p0 = scmp.ge.s32.totalorder %s29_s20, 2  ;;  %p121_p1 = scmp.ne.s32.totalorder %s657_s14, %s653_s13 }
   0x8   : > { %p122_p2 = scmp.eq.s32.totalorder %s443_s18, 1  ;;  %p127_p3 = scmp.ne.s32.totalorder %s653_s13, %s649_s12 }
   0x9   : > { %s824_s20 = smov (%p31_p0, %s29_s20), 0  ;;  %p128_p5 = scmp.eq.s32.totalorder %s444_s19, 1 }
   0xa   : > { %p736_p4 = por %p122_p2, %p121_p1  ;;  %s106_s23 = ssub.s32 %s665_s16, %s824_s20 }
   0xb   : > { %p445_p6 = scmp.ge.s32.totalorder %s669_s17, 1  ;;  %p109_p7 = scmp.eq.s32.totalorder %s106_s23, 0 }
   0xc   : > { %p743_p8 = por %p128_p5, %p127_p3  ;;  %p135_p9 = scmp.lt.s32.totalorder %s669_s17, 3 }
   0xd   : > { %s749_s25 = scalar_select %p109_p7, %s657_s14, %s111_s21  }
   0xe   : > { %p136_p10 = pnand %p445_p6, %p135_p9  ;;  %p501_p11 = scmp.eq.s32.totalorder %s443_s18, 0 }
   0xf   : > { %s155_s28 = sshll.u32 %s814_s2, 4  ;;  %s671_s29 = smov [#allocation2]   ;;  %s156_s28 = int_to_ptr.hbm [resolvable:$true] %s155_s28 }
  0x10   : > { %p493_p12 = pneg %p136_p10  ;;  %s157_s30 = sshll.u32 %s671_s29, 4  ;;  %s158_s30 = int_to_ptr.vmem [resolvable:$true] %s157_s30 }
  0x11   : > { %s672_s4 = smov 128   ;;  %s673_s5 = smov 8  }
  0x12   : > { %p494_p13 = pnand %p501_p11, %p493_p12  ;;  %181 = sbr.rel (%p136_p10) target bundleno = 318 (0x13e), region = 32 }
  0x14   : > { %496 = dma.hbm_to_vmem [thread:$0]  (!%p494_p13), %s156_s28, 1024, %s158_s30, [#allocation3], %s672_s4, %s672_s4, %s673_s5  }
  0x17   : > { %640 = dma.done.wait (%p501_p11), [#allocation3], 1024  }
  0x18   : > { %642 = vsyncadd (%p501_p11), [#allocation3], 4294966272  ;;  %p211_p0 = scmp.lt.s32.totalorder %s661_s15, 1  ;;  %v224_v2 = vld [vmem:[%s813_s1 + $0x8] sm:$0xff]  ;;  %vm229_vm0 = vcmask 130048   ;;  %v223_v3 = vld [vmem:[%s813_s1] sm:$0xff] }
  0x19   : > { %v278_v4 = vld [vmem:[#allocation2 + $0x38] sm:$0xff]  ;;  %v277_v5 = vld [vmem:[#allocation2 + $0x30] sm:$0xff]  ;;  %v276_v6 = vld [vmem:[#allocation2 + $0x28] sm:$0xff]  ;;  %vm279_vm1 = vcmask 523264   ;;  %s208_s29 = sand.u32 1, %s653_s13   ;;  %s468_s5 = sshll.u32 %s661_s15, 5 }
  0x1a   : > { %s212_s6 = scalar_select %p211_p0, %s661_s15, 1  ;;  %471 = vmatpush.msra.mxu1 %v278_v4  ;;  %472 = vmatpush.msra.mxu2 %v278_v4  ;;  %v275_v7 = vld [vmem:[#allocation2 + $0x20] sm:$0xff]  ;;  %v225_v8 = vld [vmem:[%s813_s1 + $0x10] sm:$0xff]  ;;  %v274_v9 = vld [vmem:[#allocation2 + $0x18] sm:$0xff] }
  0x1b   : > { %v273_v10 = vld [vmem:[#allocation2 + $0x10] sm:$0xff]  ;;  %v272_v11 = vld [vmem:[#allocation2 + $0x8] sm:$0xff]  ;;  %v226_v12 = vld [vmem:[%s813_s1 + $0x18] sm:$0xff]  ;;  %s451_s30 = sshll.u32 %s208_s29, 5  ;;  %s339_s8 = scalar_lea.hbm %s815_s3, %s468_s5 }
  0x1c   : > { %s467_s7 = sshll.u32 %s212_s6, 4  ;;  %473 = vmatpush.msra.mxu1 %v277_v5  ;;  %474 = vmatpush.msra.mxu2 %v277_v5  ;;  %v271_v13 = vld [vmem:[#allocation2] sm:$0xff]  ;;  %s210_s4 = scalar_lea.vmem [#allocation5], %s451_s30 }
  0x1d   : > { %s215_s10 = scalar_lea.vmem %s812_s0, %s467_s7  ;;  %s340_s9 = sshll.u32 %s210_s4, 4  ;;  %s341_s9 = int_to_ptr.vmem [resolvable:$true] %s340_s9 }
  0x1e   : > { %v228_v0 = vld [vmem:[%s215_s10 + $0x8] sm:$0xff]  ;;  %v227_v1 = vld [vmem:[%s215_s10] sm:$0xff]  ;;  %475 = vmatpush.msra.mxu1 %v276_v6  ;;  %476 = vmatpush.msra.mxu2 %v276_v6  ;;  %s342_s10 = sshll.u32 %s339_s8, 4  ;;  %s326_s11 = scalar_lea.sflag [#allocation4], %s208_s29  ;;  %s343_s10 = int_to_ptr.hbm [resolvable:$true] %s342_s10 }
  0x1f   : > { %469 = vmatpush.msra.mxu3 %v228_v0  ;;  %256 = vmatpush.msra.mxu0 %v228_v0  ;;  %s601_s18 = sshra.s32 %s343_s10, 4  ;;  %s607_s23 = scalar_lea.hbm %s815_s3, 64  ;;  %s602_s18 = int_to_ptr.hbm [resolvable:$true] %s601_s18 }
  0x20   : > { %477 = vmatpush.msra.mxu1 %v275_v7  ;;  %478 = vmatpush.msra.mxu2 %v275_v7  ;;  %s603_s19 = scalar_lea.hbm %s602_s18, 32  ;;  %p608_p5 = scmp.lt.s32.totalorder %s602_s18, %s815_s3 }
  0x21   : > { %470 = vmatpush.msra.mxu3 %v227_v1  ;;  %257 = vmatpush.msra.mxu0 %v227_v1  ;;  %p604_p1 = scmp.ne.s32.totalorder %s602_s18, %s603_s19  ;;  %p609_p6 = scmp.lt.s32.totalorder %s607_s23, %s603_s19 }
  0x22   : > { %455 = vmatmul.msk.f32.vlgmr.msra.gmra.mxu3 %vm229_vm0, %v224_v2  ;;  %454 = vmatmul.msk.f32.vlgmr.msra.gmra.mxu0 %vm229_vm0, %v223_v3 }
  0x23   : > { %300 = vmatpush.msrb.mxu0 %v278_v4  ;;  %479 = vmatpush.msra.mxu1 %v274_v9  ;;  %p605_p2 = pnand %p604_p1, %p736_p4  ;;  %p610_p7 = por %p609_p6, %p608_p5 }
  0x24   : > { %480 = vmatpush.msra.mxu2 %v274_v9 }
  0x25   : > { %301 = vmatpush.msrb.mxu0 %v277_v5  ;;  %481 = vmatpush.msra.mxu1 %v273_v10  ;;  %p606_p3 = pneg %p605_p2 }
  0x26   : > { %482 = vmatpush.msra.mxu2 %v273_v10 }
  0x27   : > { %302 = vmatpush.msrb.mxu0 %v276_v6  ;;  %483 = vmatpush.msra.mxu1 %v272_v11  ;;  %p611_p9 = pnand %p610_p7, %p606_p3 }
  0x28   : > { %484 = vmatpush.msra.mxu2 %v272_v11 }
  0x29   : > { %303 = vmatpush.msrb.mxu0 %v275_v7  ;;  %485 = vmatpush.msra.mxu1 %v271_v13 }
  0x2a   : > { %456 = vmatmul.msk.f32.gmra.mxu3 %vm229_vm0, %v225_v8  ;;  %486 = vmatpush.msra.mxu2 %v271_v13 }
  0x2b   : > { %304 = vmatpush.msrb.mxu0 %v274_v9 }
  0x2d   : > { %305 = vmatpush.msrb.mxu0 %v273_v10 }
  0x2f   : > { %306 = vmatpush.msrb.mxu0 %v272_v11 }
  0x31   : > { %307 = vmatpush.msrb.mxu0 %v271_v13 }
  0x32   : > { %457 = vmatmul.msk.f32.gmra.mxu3 %vm229_vm0, %v226_v12 }
  0x9f   : > { %v259_v14 = vpop.f32.mrf.mxu0 }
  0xa0   : > { %458 = vmatmul.msk.f32.vlgmr.msrb.gmra.mxu0 %vm279_vm1, %v259_v14 }
  0xa5   : > { %v262_v15 = vpop.f32.mrf.mxu3 }
  0xa6   : > { %459 = vmatmul.msk.f32.vlgmr.msra.gmra.mxu1 %vm279_vm1, %v262_v15 }
  0xad   : > { %v265_v16 = vpop.f32.mrf.mxu3 }
  0xae   : > { %460 = vmatmul.msk.f32.vlgmr.msra.gmra.mxu2 %vm279_vm1, %v265_v16 }
  0xb5   : > { %v268_v17 = vpop.f32.mrf.mxu3 }
  0xb6   : > { %461 = vmatmul.msk.f32.gmra.mxu2 %vm279_vm1, %v268_v17 }
 0x11d   : > { %v309_v18 = vpop.f32.mrf.mxu0 }
 0x11e   : > { %321 = vst [vmem:[%s210_s4] sm:$0xff] %v309_v18 }
 0x123   : > { %v312_v19 = vpop.f32.mrf.mxu1 }
 0x124   : > { %322 = vst [vmem:[%s210_s4 + $0x8] sm:$0xff] %v312_v19 }
 0x131   : > { %v315_v20 = vpop.f32.mrf.mxu2 }
 0x132   : > { %323 = vst [vmem:[%s210_s4 + $0x10] sm:$0xff] %v315_v20 }
 0x139   : > { %v318_v21 = vpop.f32.mrf.mxu2 }
 0x13a   : > { %324 = vst [vmem:[%s210_s4 + $0x18] sm:$0xff] %v318_v21 }
 0x13b   : > { %614 = shalt.err (!%p611_p9)
}
 0x13c   : > { %s674_s28 = smov 128   ;;  %s675_s29 = smov 8  }
 0x13d   : > { %491 = dma.vmem_to_hbm [thread:$0]  (%p736_p4), %s341_s9, 512, %s343_s10, %s326_s11, %s674_s28, %s674_s28, %s675_s29  }
 0x13e PF: > { %p503_p10 = scmp.ge.s32.totalorder %s669_s17, 2  ;;  %s357_s30 = sand.u32 1, %s649_s12  }
 0x13f   : > { %s358_s4 = scalar_lea.sflag [#allocation4], %s357_s30 }
 0x140   : > { %p498_p11 = pnand %p503_p10, %p743_p8 }
 0x142   : > { %p499_p12 = pneg %p498_p11 }
 0x144   : > { %644 = dma.done.wait (%p499_p12), %s358_s4, 512  }
 0x145   : > { %646 = vsyncadd (%p499_p12), %s358_s4, 4294966784  ;;  %s17_s17 = sadd.s32 1, %s669_s17   ;;  %s818_s12 = smov %s653_s13 }
 0x146   : > { %p14_p13 = scmp.ge.s32.totalorder %s17_s17, 4   ;;  %s819_s13 = smov %s657_s14 }
 0x147   : > { %s820_s14 = smov %s749_s25  ;;  %s821_s15 = smov %s665_s16 }
 0x148   : > { %s822_s16 = smov %s824_s20  ;;  %16 = sbr.rel (!%p14_p13) target bundleno = 5 (0x5), region = 75 }
 0x14d   :  { %364 = vsyncpa [#allocation3], 1 }
 0x14e   :  { %366 = vsyncpa [#allocation3 + $0x1], 1 }
 0x14f   :  { %367 = vsyncpa [#allocation4], 1 }
 0x150   :  { %369 = vsyncpa [#allocation4 + $0x1], 1 }

</bundles_post_ra>
